<compile_context>
chip_gen: v5e
topology: v5e:2x2
jax: 0.10.0
libtpu: 0.0.40
codegen_flags: <defaults>
</compile_context>

<pallas_src>
import functools

import jax
import jax.numpy as jnp
from jax.experimental import pallas as pl
from jax.experimental.pallas import tpu as pltpu


def _round_up(a, b):
    return (a + b - 1) // b * b


def _cdiv(a, b):
    return (a + b - 1) // b


# ---------------------------------------------------------------------------
# Kernels
# ---------------------------------------------------------------------------

def _region_select(xc, mn, mx, perc, proxy, *, region_num, chain_dtype):
    """Sorted-threshold overwrite: 1 compare + 1 select per region boundary.

    xc    : (TC, L)   pixels, chain_dtype
    mn/mx : (TC, 1)   per-channel min / max, f32
    perc  : (TC, R-1) region percentiles, sorted ascending, f32
    proxy : (TC, R)   proxy percentiles, f32
    """
    R = region_num
    span = mx - mn                                                  # (TC, 1)
    bounds = [perc[:, j:j + 1] * span + mn for j in range(R - 1)]   # sorted
    left = [mn] + bounds                                            # R x (TC,1)
    right = bounds + [mx + 1e-6]                                    # R x (TC,1)

    # collapse_to_val == 'inside_random': proxy value of each region.
    vals = [left[r] + proxy[:, r:r + 1] * (right[r] - left[r]) for r in range(R)]

    left_c = [b.astype(chain_dtype) for b in left]
    vals_c = [v.astype(chain_dtype) for v in vals]

    # A pixel's region id equals the number of boundaries <= x, so the last
    # overwrite that fires picks the right region (argmax-equivalent, only
    # 2 full-width VPU ops per region).  First select also broadcasts vals[0].
    out = jnp.where(xc >= left_c[1], vals_c[1], vals_c[0])
    for r in range(2, R):
        out = jnp.where(xc >= left_c[r], vals_c[r], out)
    return out


def _rq_fused_kernel(x_ref, perc_ref, proxy_ref, o_ref, *, region_num, chain_dtype):
    """Full-row block: kernel does the per-channel min/max itself."""
    xc = x_ref[...].astype(chain_dtype)                             # (TC, HW)
    mn = jnp.min(xc, axis=1, keepdims=True).astype(jnp.float32)
    mx = jnp.max(xc, axis=1, keepdims=True).astype(jnp.float32)
    out = _region_select(xc, mn, mx,
                         perc_ref[...].astype(jnp.float32),
                         proxy_ref[...].astype(jnp.float32),
                         region_num=region_num, chain_dtype=chain_dtype)
    o_ref[...] = out.astype(o_ref.dtype)


def _rq_split_kernel(x_ref, mn_ref, mx_ref, perc_ref, proxy_ref, o_ref, *,
                     region_num, chain_dtype):
    """Spatially-tiled block: min/max precomputed in the wrapper."""
    xc = x_ref[...].astype(chain_dtype)                             # (TC, THW)
    out = _region_select(xc,
                         mn_ref[...].astype(jnp.float32),
                         mx_ref[...].astype(jnp.float32),
                         perc_ref[...].astype(jnp.float32),
                         proxy_ref[...].astype(jnp.float32),
                         region_num=region_num, chain_dtype=chain_dtype)
    o_ref[...] = out.astype(o_ref.dtype)


# ---------------------------------------------------------------------------
# Wrapper
# ---------------------------------------------------------------------------

def _tpu_budget():
    """Returns (physical VMEM bytes, TensorCores per chip), conservative on failure."""
    vmem_phys = None
    num_tc = 1
    try:
        info = pltpu.get_tpu_info()
        vmem_phys = int(getattr(info, "vmem_capacity_bytes"))
    except Exception:
        vmem_phys = None
    try:
        kind = jax.devices()[0].device_kind.lower()
    except Exception:
        kind = ""
    if "v7" in kind:
        num_tc = 2
        if vmem_phys is None:
            vmem_phys = 64 * 1024 * 1024
    elif ("v5 lite" in kind) or ("v5e" in kind) or ("v6" in kind):
        if vmem_phys is None:
            vmem_phys = 128 * 1024 * 1024
    if vmem_phys is None:
        vmem_phys = 64 * 1024 * 1024      # conservative default
    return vmem_phys, num_tc


def randomized_quantization_aug(x, region_percentiles, proxy_percentiles, *,
                                region_num, _force_split=False):
    """x: (B, c, H, W); region_percentiles: (B*c, R-1); proxy_percentiles: (B*c, R)."""
    assert region_num >= 2, "region_num must be >= 2"
    B, c, H, W = x.shape
    C = B * c
    HW = H * W
    R = region_num

    xr = x.reshape(C, HW)                               # free view, no copies
    perc = jnp.sort(region_percentiles.astype(jnp.float32), axis=1)
    proxy = proxy_percentiles.astype(jnp.float32)

    itemsize = jnp.dtype(x.dtype).itemsize
    chain_dtype = jnp.bfloat16 if x.dtype == jnp.bfloat16 else jnp.float32
    chain_isize = jnp.dtype(chain_dtype).itemsize
    sub = 8 * max(1, 4 // itemsize)                     # sublane tile: f32=8, bf16=16, i8=32

    vmem_phys, num_tc = _tpu_budget()
    # ~48 MiB on v7x (64 MiB physical), ~96 MiB on v5e/v6e (128 MiB physical).
    vmem_limit = int(min(vmem_phys * 3 // 4, 96 * 1024 * 1024))
    target_block = 8 * 1024 * 1024                      # ~8 MiB of input per grid step

    # Fused-path VMEM cost per channel row: in + out double-buffered plus
    # ~3 chain-dtype full-width temporaries for the compare/select chain.
    row_cost = HW * (4 * itemsize + 3 * chain_isize)
    min_tc = C if C <= sub else sub
    fused_ok = min_tc * row_cost <= vmem_limit
    # Small-C / large-image inputs would give a single grid step; on a 2-TC
    # chip (v7x) trade one extra HBM read of x for spatial parallelism.
    single_step_big = (fused_ok and C <= sub and num_tc >= 2
                       and C * HW * itemsize >= 16 * 1024 * 1024)
    use_split = (not fused_ok) or single_step_big or _force_split

    if not use_split:
        # ----- fused path: 1-D parallel grid over channel tiles -----
        if C <= sub:
            TC = C                                      # full-dim block (exempt from /8)
        else:
            tc = min(vmem_limit // row_cost,
                     max(sub, target_block // (HW * itemsize)),
                     _round_up(_cdiv(C, 2), sub))       # keep >= 2 grid steps
            TC = max(sub, tc // sub * sub)
        grid = (_cdiv(C, TC),)
        kernel = functools.partial(_rq_fused_kernel, region_num=R,
                                   chain_dtype=chain_dtype)
        out = pl.pallas_call(
            kernel,
            out_shape=jax.ShapeDtypeStruct((C, HW), x.dtype),
            grid_spec=pltpu.PrefetchScalarGridSpec(
                num_scalar_prefetch=0,
                grid=grid,
                in_specs=[
                    pl.BlockSpec((TC, HW), lambda i: (i, 0)),
                    pl.BlockSpec((TC, R - 1), lambda i: (i, 0)),
                    pl.BlockSpec((TC, R), lambda i: (i, 0)),
                ],
                out_specs=pl.BlockSpec((TC, HW), lambda i: (i, 0)),
            ),
            compiler_params=pltpu.CompilerParams(
                dimension_semantics=("parallel",),
                vmem_limit_bytes=vmem_limit,
            ),
        )(xr, perc, proxy)
    else:
        # ----- split path: min/max in the wrapper, 2-D parallel grid -----
        mn = jnp.min(xr, axis=1, keepdims=True).astype(jnp.float32)
        mx = jnp.max(xr, axis=1, keepdims=True).astype(jnp.float32)
        TC = C if C <= sub else sub
        per_elem = 4 * itemsize + 3 * chain_isize
        thw = min(vmem_limit // (TC * per_elem),
                  max(128, target_block // (TC * itemsize)),
                  HW)
        THW = HW if thw >= HW else max(128, thw // 128 * 128)
        if _force_split and HW > 128:
            THW = 128                                   # test hook: exercise spatial tiling
        grid = (_cdiv(C, TC), _cdiv(HW, THW))
        kernel = functools.partial(_rq_split_kernel, region_num=R,
                                   chain_dtype=chain_dtype)
        out = pl.pallas_call(
            kernel,
            out_shape=jax.ShapeDtypeStruct((C, HW), x.dtype),
            grid_spec=pltpu.PrefetchScalarGridSpec(
                num_scalar_prefetch=0,
                grid=grid,
                in_specs=[
                    pl.BlockSpec((TC, THW), lambda i, j: (i, j)),
                    pl.BlockSpec((TC, 1), lambda i, j: (i, 0)),
                    pl.BlockSpec((TC, 1), lambda i, j: (i, 0)),
                    pl.BlockSpec((TC, R - 1), lambda i, j: (i, 0)),
                    pl.BlockSpec((TC, R), lambda i, j: (i, 0)),
                ],
                out_specs=pl.BlockSpec((TC, THW), lambda i, j: (i, j)),
            ),
            compiler_params=pltpu.CompilerParams(
                dimension_semantics=("parallel", "parallel"),
                vmem_limit_bytes=vmem_limit,
            ),
        )(xr, mn, mx, perc, proxy)

    return out.reshape(B, c, H, W)


# ---------------------------------------------------------------------------
# Plain-JAX reference (reproduces the PyTorch forward) and test
# ---------------------------------------------------------------------------

def _reference(x, region_percentiles, proxy_percentiles, *, region_num):
    B, c, H, W = x.shape
    C = B * c
    xr = x.reshape(C, H * W).astype(jnp.float32)
    mn = xr.min(axis=1, keepdims=True)
    mx = xr.max(axis=1, keepdims=True)
    pos = region_percentiles * (mx - mn) + mn
    spos = jnp.sort(pos, axis=1)
    right_check = jnp.concatenate([spos, mx + 1.0], axis=1)
    right = jnp.concatenate([spos, mx + 1e-6], axis=1)
    left = jnp.concatenate([mn, spos], axis=1)
    rand_vals = left + proxy_percentiles * (right - left)                 # (C, R)
    inside = (xr[:, None, :] >= left[:, :, None]) & (xr[:, None, :] < right_check[:, :, None])
    region_id = jnp.argmax(inside.astype(jnp.int32), axis=1)              # (C, HW)
    proxy_vals = jnp.take_along_axis(rand_vals, region_id, axis=1)        # (C, HW)
    return proxy_vals.reshape(B, c, H, W).astype(x.dtype)


if __name__ == "__main__":
    REGION_NUM = 8

    def run_case(key, B, c, H, W, **kw):
        kx, k1, k2 = jax.random.split(key, 3)
        C = B * c
        x = jax.random.normal(kx, (B, c, H, W), dtype=jnp.float32)
        # torch.rand equivalents (deterministic, built in-script):
        region_percentiles = jax.random.uniform(k1, (C, REGION_NUM - 1), dtype=jnp.float32)
        proxy_percentiles = jax.random.uniform(k2, (C, REGION_NUM), dtype=jnp.float32)
        out = randomized_quantization_aug(
            x, region_percentiles, proxy_percentiles, region_num=REGION_NUM, **kw)
        out = jax.block_until_ready(out)
        ref = _reference(x, region_percentiles, proxy_percentiles, region_num=REGION_NUM)
        assert out.shape == x.shape and out.dtype == x.dtype
        assert jnp.allclose(out, ref, atol=1e-5, rtol=1e-5), f"mismatch at {(B, c, H, W)}"

    key = jax.random.PRNGKey(0)
    k0, k1, k2 = jax.random.split(key, 3)
    run_case(k0, 2, 4, 16, 16)                       # fused path, lane-aligned HW
    run_case(k1, 3, 3, 11, 13)                       # fused path, ragged C + unaligned HW (no padding)
    run_case(k2, 2, 4, 16, 16, _force_split=True)    # split path: wrapper min/max, 2-D grid
    # TODO(synk): v7x TensorCore count is inferred from device_kind ("v7"); a stable
    # pltpu.TpuInfo field would make the small-C megacore heuristic exact.
    print("KERNEL_OK")
</pallas_src>

<mosaic_0001>
module attributes {stable_mosaic.version = 11 : i64} {
  func.func @_rq_fused_kernel(%arg0: i32, %arg1: memref<8x256xf32, #tpu.memory_space<vmem>>, %arg2: memref<8x7xf32, #tpu.memory_space<vmem>>, %arg3: memref<8x8xf32, #tpu.memory_space<vmem>>, %arg4: memref<8x256xf32, #tpu.memory_space<vmem>>) attributes {dimension_semantics = [#tpu.dimension_semantics<parallel>], iteration_bounds = array<i64: 1>, scalar_prefetch = 0 : i64, scratch_operands = 0 : i64, tpu.core_type = #tpu.core_type<tc>, window_params = [{transform_indices = @transform_0, window_bounds = array<i64: 8, 256>}, {transform_indices = @transform_1, window_bounds = array<i64: 8, 7>}, {transform_indices = @transform_2, window_bounds = array<i64: 8, 8>}, {transform_indices = @transform_3, window_bounds = array<i64: 8, 256>}]} {
    %c0 = arith.constant 0 : index
    %c0_0 = arith.constant 0 : index
    %0 = vector.load %arg1[%c0, %c0_0] : memref<8x256xf32, #tpu.memory_space<vmem>>, vector<8x256xf32>
    %cst = arith.constant dense<0x7F800000> : vector<8xf32>
    %1 = vector.multi_reduction <minimumf>, %0, %cst [1] : vector<8x256xf32> to vector<8xf32>
    %2 = vector.shape_cast %1 : vector<8xf32> to vector<8x1xf32>
    %cst_1 = arith.constant dense<0xFF800000> : vector<8xf32>
    %3 = vector.multi_reduction <maximumf>, %0, %cst_1 [1] : vector<8x256xf32> to vector<8xf32>
    %4 = vector.shape_cast %3 : vector<8xf32> to vector<8x1xf32>
    %c0_2 = arith.constant 0 : index
    %c0_3 = arith.constant 0 : index
    %5 = vector.load %arg2[%c0_2, %c0_3] : memref<8x7xf32, #tpu.memory_space<vmem>>, vector<8x7xf32>
    %c0_4 = arith.constant 0 : index
    %c0_5 = arith.constant 0 : index
    %6 = vector.load %arg3[%c0_4, %c0_5] : memref<8x8xf32, #tpu.memory_space<vmem>>, vector<8x8xf32>
    %7 = arith.subf %4, %2 : vector<8x1xf32>
    %8 = vector.extract_strided_slice %5 {offsets = [0, 0], sizes = [8, 1], strides = [1, 1]} : vector<8x7xf32> to vector<8x1xf32>
    %9 = arith.mulf %8, %7 : vector<8x1xf32>
    %10 = arith.addf %9, %2 : vector<8x1xf32>
    %11 = vector.extract_strided_slice %5 {offsets = [0, 1], sizes = [8, 1], strides = [1, 1]} : vector<8x7xf32> to vector<8x1xf32>
    %12 = arith.mulf %11, %7 : vector<8x1xf32>
    %13 = arith.addf %12, %2 : vector<8x1xf32>
    %14 = vector.extract_strided_slice %5 {offsets = [0, 2], sizes = [8, 1], strides = [1, 1]} : vector<8x7xf32> to vector<8x1xf32>
    %15 = arith.mulf %14, %7 : vector<8x1xf32>
    %16 = arith.addf %15, %2 : vector<8x1xf32>
    %17 = vector.extract_strided_slice %5 {offsets = [0, 3], sizes = [8, 1], strides = [1, 1]} : vector<8x7xf32> to vector<8x1xf32>
    %18 = arith.mulf %17, %7 : vector<8x1xf32>
    %19 = arith.addf %18, %2 : vector<8x1xf32>
    %20 = vector.extract_strided_slice %5 {offsets = [0, 4], sizes = [8, 1], strides = [1, 1]} : vector<8x7xf32> to vector<8x1xf32>
    %21 = arith.mulf %20, %7 : vector<8x1xf32>
    %22 = arith.addf %21, %2 : vector<8x1xf32>
    %23 = vector.extract_strided_slice %5 {offsets = [0, 5], sizes = [8, 1], strides = [1, 1]} : vector<8x7xf32> to vector<8x1xf32>
    %24 = arith.mulf %23, %7 : vector<8x1xf32>
    %25 = arith.addf %24, %2 : vector<8x1xf32>
    %26 = vector.extract_strided_slice %5 {offsets = [0, 6], sizes = [8, 1], strides = [1, 1]} : vector<8x7xf32> to vector<8x1xf32>
    %27 = arith.mulf %26, %7 : vector<8x1xf32>
    %28 = arith.addf %27, %2 : vector<8x1xf32>
    %cst_6 = arith.constant 9.99999997E-7 : f32
    %29 = vector.broadcast %cst_6 : f32 to vector<8x1xf32>
    %30 = arith.addf %4, %29 : vector<8x1xf32>
    %31 = vector.extract_strided_slice %6 {offsets = [0, 0], sizes = [8, 1], strides = [1, 1]} : vector<8x8xf32> to vector<8x1xf32>
    %32 = arith.subf %10, %2 : vector<8x1xf32>
    %33 = arith.mulf %31, %32 : vector<8x1xf32>
    %34 = arith.addf %2, %33 : vector<8x1xf32>
    %35 = vector.extract_strided_slice %6 {offsets = [0, 1], sizes = [8, 1], strides = [1, 1]} : vector<8x8xf32> to vector<8x1xf32>
    %36 = arith.subf %13, %10 : vector<8x1xf32>
    %37 = arith.mulf %35, %36 : vector<8x1xf32>
    %38 = arith.addf %10, %37 : vector<8x1xf32>
    %39 = vector.extract_strided_slice %6 {offsets = [0, 2], sizes = [8, 1], strides = [1, 1]} : vector<8x8xf32> to vector<8x1xf32>
    %40 = arith.subf %16, %13 : vector<8x1xf32>
    %41 = arith.mulf %39, %40 : vector<8x1xf32>
    %42 = arith.addf %13, %41 : vector<8x1xf32>
    %43 = vector.extract_strided_slice %6 {offsets = [0, 3], sizes = [8, 1], strides = [1, 1]} : vector<8x8xf32> to vector<8x1xf32>
    %44 = arith.subf %19, %16 : vector<8x1xf32>
    %45 = arith.mulf %43, %44 : vector<8x1xf32>
    %46 = arith.addf %16, %45 : vector<8x1xf32>
    %47 = vector.extract_strided_slice %6 {offsets = [0, 4], sizes = [8, 1], strides = [1, 1]} : vector<8x8xf32> to vector<8x1xf32>
    %48 = arith.subf %22, %19 : vector<8x1xf32>
    %49 = arith.mulf %47, %48 : vector<8x1xf32>
    %50 = arith.addf %19, %49 : vector<8x1xf32>
    %51 = vector.extract_strided_slice %6 {offsets = [0, 5], sizes = [8, 1], strides = [1, 1]} : vector<8x8xf32> to vector<8x1xf32>
    %52 = arith.subf %25, %22 : vector<8x1xf32>
    %53 = arith.mulf %51, %52 : vector<8x1xf32>
    %54 = arith.addf %22, %53 : vector<8x1xf32>
    %55 = vector.extract_strided_slice %6 {offsets = [0, 6], sizes = [8, 1], strides = [1, 1]} : vector<8x8xf32> to vector<8x1xf32>
    %56 = arith.subf %28, %25 : vector<8x1xf32>
    %57 = arith.mulf %55, %56 : vector<8x1xf32>
    %58 = arith.addf %25, %57 : vector<8x1xf32>
    %59 = vector.extract_strided_slice %6 {offsets = [0, 7], sizes = [8, 1], strides = [1, 1]} : vector<8x8xf32> to vector<8x1xf32>
    %60 = arith.subf %30, %28 : vector<8x1xf32>
    %61 = arith.mulf %59, %60 : vector<8x1xf32>
    %62 = arith.addf %28, %61 : vector<8x1xf32>
    %63 = vector.broadcast %10 : vector<8x1xf32> to vector<8x256xf32>
    %64 = arith.cmpf oge, %0, %63 : vector<8x256xf32>
    %65 = vector.shape_cast %38 : vector<8x1xf32> to vector<8x1xf32>
    %66 = vector.broadcast %65 : vector<8x1xf32> to vector<8x256xf32>
    %67 = vector.shape_cast %34 : vector<8x1xf32> to vector<8x1xf32>
    %68 = vector.broadcast %67 : vector<8x1xf32> to vector<8x256xf32>
    %69 = arith.select %64, %66, %68 : vector<8x256xi1>, vector<8x256xf32>
    %70 = vector.broadcast %13 : vector<8x1xf32> to vector<8x256xf32>
    %71 = arith.cmpf oge, %0, %70 : vector<8x256xf32>
    %72 = vector.shape_cast %42 : vector<8x1xf32> to vector<8x1xf32>
    %73 = vector.broadcast %72 : vector<8x1xf32> to vector<8x256xf32>
    %74 = arith.select %71, %73, %69 : vector<8x256xi1>, vector<8x256xf32>
    %75 = vector.broadcast %16 : vector<8x1xf32> to vector<8x256xf32>
    %76 = arith.cmpf oge, %0, %75 : vector<8x256xf32>
    %77 = vector.shape_cast %46 : vector<8x1xf32> to vector<8x1xf32>
    %78 = vector.broadcast %77 : vector<8x1xf32> to vector<8x256xf32>
    %79 = arith.select %76, %78, %74 : vector<8x256xi1>, vector<8x256xf32>
    %80 = vector.broadcast %19 : vector<8x1xf32> to vector<8x256xf32>
    %81 = arith.cmpf oge, %0, %80 : vector<8x256xf32>
    %82 = vector.shape_cast %50 : vector<8x1xf32> to vector<8x1xf32>
    %83 = vector.broadcast %82 : vector<8x1xf32> to vector<8x256xf32>
    %84 = arith.select %81, %83, %79 : vector<8x256xi1>, vector<8x256xf32>
    %85 = vector.broadcast %22 : vector<8x1xf32> to vector<8x256xf32>
    %86 = arith.cmpf oge, %0, %85 : vector<8x256xf32>
    %87 = vector.shape_cast %54 : vector<8x1xf32> to vector<8x1xf32>
    %88 = vector.broadcast %87 : vector<8x1xf32> to vector<8x256xf32>
    %89 = arith.select %86, %88, %84 : vector<8x256xi1>, vector<8x256xf32>
    %90 = vector.broadcast %25 : vector<8x1xf32> to vector<8x256xf32>
    %91 = arith.cmpf oge, %0, %90 : vector<8x256xf32>
    %92 = vector.shape_cast %58 : vector<8x1xf32> to vector<8x1xf32>
    %93 = vector.broadcast %92 : vector<8x1xf32> to vector<8x256xf32>
    %94 = arith.select %91, %93, %89 : vector<8x256xi1>, vector<8x256xf32>
    %95 = vector.broadcast %28 : vector<8x1xf32> to vector<8x256xf32>
    %96 = arith.cmpf oge, %0, %95 : vector<8x256xf32>
    %97 = vector.shape_cast %62 : vector<8x1xf32> to vector<8x1xf32>
    %98 = vector.broadcast %97 : vector<8x1xf32> to vector<8x256xf32>
    %99 = arith.select %96, %98, %94 : vector<8x256xi1>, vector<8x256xf32>
    %c0_7 = arith.constant 0 : index
    %c0_8 = arith.constant 0 : index
    %100 = vector.load %arg4[%c0_7, %c0_8] : memref<8x256xf32, #tpu.memory_space<vmem>>, vector<8x256xf32>
    tpu.vector_store %arg4[%c0_7, %c0_8], %99 {strides = array<i32>} : memref<8x256xf32, #tpu.memory_space<vmem>>, vector<8x256xf32>,
    return
  }
  func.func @transform_0(%arg0: i32) -> (i32, i32) {
    %c0_i32 = arith.constant 0 : i32
    %c0_i32_0 = arith.constant 0 : i32
    return %arg0, %c0_i32 : i32, i32
  }
  func.func @transform_1(%arg0: i32) -> (i32, i32) {
    %c0_i32 = arith.constant 0 : i32
    %c0_i32_0 = arith.constant 0 : i32
    return %arg0, %c0_i32 : i32, i32
  }
  func.func @transform_2(%arg0: i32) -> (i32, i32) {
    %c0_i32 = arith.constant 0 : i32
    %c0_i32_0 = arith.constant 0 : i32
    return %arg0, %c0_i32 : i32, i32
  }
  func.func @transform_3(%arg0: i32) -> (i32, i32) {
    %c0_i32 = arith.constant 0 : i32
    %c0_i32_0 = arith.constant 0 : i32
    return %arg0, %c0_i32 : i32, i32
  }
}

</mosaic_0001>

<bundles_post_ra>
// kernel: tpu_custom_call.1
= control target key start
LH: loop header
LB: loop body
LE: loop exit
PB: predicated region body
PF: predicated region fallthrough
CT: control target
= control target key end

     0   :  { %8 = vsyncpa [#allocation3], 0  ;;  %s404_s0 = inlined_call_operand.hbm [shape: f32[8,256], index: 0, kind: input, shape index: {}]   ;;  %s405_s1 = inlined_call_operand.hbm [shape: f32[8,7], index: 1, kind: input, shape index: {}]   ;;  %s406_s2 = inlined_call_operand.hbm [shape: f32[8,8], index: 2, kind: input, shape index: {}]   ;;  %s407_s3 = inlined_call_operand.hbm [shape: f32[8,256], index: 3, kind: output, shape index: {}]  }
   0x1   :  { %9 = vsyncpa [#allocation6], 0  ;;  %s27_s14 = sshll.u32 %s405_s1, 4  ;;  %s28_s14 = int_to_ptr.hbm [resolvable:$true] %s27_s14 }
   0x2   :  { %10 = vsyncpa [#allocation4], 0  ;;  %s337_s15 = smov [#allocation5]   ;;  %s16_s19 = sshll.u32 %s404_s0, 4  ;;  %s17_s19 = int_to_ptr.hbm [resolvable:$true] %s16_s19 }
   0x3   :  { %s29_s16 = sshll.u32 %s337_s15, 4  ;;  %s338_s20 = smov [#allocation2]   ;;  %s30_s16 = int_to_ptr.vmem [resolvable:$true] %s29_s16 }
   0x4   :  { %32 = dma.hbm_to_vmem [thread:$0]  %s28_s14, 128, %s30_s16, [#allocation6]  }
   0x5   :  { %s18_s21 = sshll.u32 %s338_s20, 4  ;;  %s38_s24 = sshll.u32 %s406_s2, 4  ;;  %s19_s21 = int_to_ptr.vmem [resolvable:$true] %s18_s21  ;;  %s39_s24 = int_to_ptr.hbm [resolvable:$true] %s38_s24 }
   0x6   :  { %21 = dma.hbm_to_vmem [thread:$0]  %s17_s19, 256, %s19_s21, [#allocation3]  }
   0x7   :  { %s339_s1 = smov [#allocation7]  }
   0x8   :  { %s40_s25 = sshll.u32 %s339_s1, 4  ;;  %s41_s25 = int_to_ptr.vmem [resolvable:$true] %s40_s25 }
   0x9   :  { %43 = dma.hbm_to_vmem [thread:$0]  %s39_s24, 128, %s41_s25, [#allocation6]  }
   0xa   :  { %331 = dma.done.wait [#allocation3], 256  }
   0xb   :  { %332 = vsyncadd [#allocation3], 4294967040 }
   0xc   :  { %333 = dma.done.wait [#allocation6], 256  }
   0xd   :  { %334 = vsyncadd [#allocation6], 4294967040  ;;  %v379_v0 = vld [vmem:[#allocation2] sm:$0xff]  ;;  %v381_v1 = vld [vmem:[#allocation2 + $0x8] sm:$0xff]  ;;  %v340_v4 = vmov 0   ;;  %v341_v5 = vmov 1  }
   0xe   :  { %v58_v2 = vmin.f32 %v379_v0, %v381_v1  ;;  %v61_v3 = vmax.f32 %v379_v0, %v381_v1  ;;  %219 = vset.pattern.permute.xlu0 %v340_v4  ;;  %224 = vset.pattern.permute.xlu2 %v340_v4  ;;  %v64_v7 = vld [vmem:[#allocation5] sm:$0xff]  ;;  %v65_v12 = vld [vmem:[#allocation7] sm:$0xff]  ;;  %s342_s0 = smov 1   ;;  %v343_v18 = vmov 5   ;;  %v344_v19 = vmov 2   ;;  %s347_s2 = smov 127  }
   0xf   :  { %220 = vset.pattern.permute.xlu1 %v341_v5  ;;  %v345_v20 = vmov 3   ;;  %v346_v21 = vmov 4   ;;  %v348_v27 = vmov 6   ;;  %s349_s26 = smov [#allocation8]   ;;  %s195_s30 = sshll.u32 %s407_s3, 4  ;;  %s196_s30 = int_to_ptr.hbm [resolvable:$true] %s195_s30 }
  0x10   :  { %59 = vmin.xlane.f32.xlu0 %v58_v2  ;;  %s193_s27 = sshll.u32 %s349_s26, 4  ;;  %s194_s27 = int_to_ptr.vmem [resolvable:$true] %s193_s27 }
  0x18   :  { %62 = vmax.xlane.f32.xlu0 %v61_v3 }
  0x83   :  { %v60_v6 = vpop.xlane.xlu0 %59 }
  0x8b   :  { %v63_v8 = vpop.xlane.xlu0 %62 }
  0x8c   :  { %v66_v9 = vsub.f32 %v63_v8, %v60_v6  ;;  %v69_v15 = vadd.f32 1e-06, %v63_v8 }
  0x8e   :  { %v67_v10 = vmul.f32 %v66_v9, %v64_v7 }
  0x90   :  { %v68_v11 = vadd.f32 %v67_v10, %v60_v6 }
  0x92   :  { %96 = vperm.xlu0 %219, %v68_v11   ;;  %74 = vrot.lane.b32.xlu1 %v68_v11, %s342_s0  ;;  %v70_v13 = vsub.f32 %v68_v11, %v60_v6  ;;  %v84_v17 = vsub.f32 %v69_v15, %v68_v11 }
  0x94   :  { %v71_v14 = vmul.f32 %v70_v13, %v65_v12 }
  0x96   :  { %v72_v16 = vadd.f32 %v71_v14, %v60_v6 }
  0x98   :  { %108 = vperm.xlu2 %224, %v72_v16  }
  0x9a   :  { %230 = vset.pattern.permute.xlu0 %v343_v18  ;;  %86 = vrot.lane.b32.xlu1 %v84_v17, %s342_s0 }
  0x9b   :  { %162 = vperm.xlu0 %230, %v68_v11  }
  0xa0   :  { %226 = vset.pattern.permute.xlu2 %v341_v5 }
  0xa2   :  { %114 = vperm.xlu1 %220, %v68_v11  }
  0xa3   :  { %234 = vset.pattern.permute.xlu0 %v348_v27 }
  0xaa   :  { %221 = vset.pattern.permute.xlu1 %v344_v19 }
  0xab   :  { %126 = vperm.xlu1 %221, %v68_v11  }
  0xb3   :  { %222 = vset.pattern.permute.xlu1 %v345_v20 }
  0xb4   :  { %138 = vperm.xlu1 %222, %v68_v11  }
  0xbc   :  { %223 = vset.pattern.permute.xlu1 %v346_v21 }
  0xbd   :  { %150 = vperm.xlu1 %223, %v68_v11  }
  0xc5   :  { %225 = vset.pattern.permute.xlu1 %v340_v4 }
  0xf2   :  { %v109_v28 = vpop.permute.xlu2 %108 }
 0x104   :  { %v75_v22 = vpop.permute.xlu1 %74  ;;  %v97_v41 = vpop.permute.xlu0 %96 }
 0x105   :  { %v77_v23 = vsub.f32 %v68_v11, %v75_v22  ;;  %vm99_vm0 = vcmp.ge.f32.partialorder %v379_v0, %v97_v41  ;;  %vm100_vm1 = vcmp.ge.f32.partialorder %v381_v1, %v97_v41 }
 0x107   :  { %v78_v24 = vmul.f32 %v77_v23, %v65_v12 }
 0x109   :  { %80 = vrot.lane.b32.xlu2 %v78_v24, %s347_s2 }
 0x10c   :  { %v87_v25 = vpop.permute.xlu1 %86 }
 0x10d   :  { %v89_v26 = vmul.f32 %v87_v25, %v65_v12  ;;  %v163_v50 = vpop.permute.xlu0 %162 }
 0x10e   :  { %vm165_vm10 = vcmp.ge.f32.partialorder %v379_v0, %v163_v50  ;;  %vm166_vm11 = vcmp.ge.f32.partialorder %v381_v1, %v163_v50 }
 0x111   :  { %91 = vrot.lane.b32.xlu2 %v89_v26, %s347_s2 }
 0x114   :  { %v115_v33 = vpop.permute.xlu1 %114 }
 0x115   :  { %vm117_vm2 = vcmp.ge.f32.partialorder %v379_v0, %v115_v33  ;;  %vm118_vm3 = vcmp.ge.f32.partialorder %v381_v1, %v115_v33 }
 0x11d   :  { %v127_v34 = vpop.permute.xlu1 %126 }
 0x11e   :  { %vm129_vm4 = vcmp.ge.f32.partialorder %v379_v0, %v127_v34  ;;  %vm130_vm5 = vcmp.ge.f32.partialorder %v381_v1, %v127_v34 }
 0x126   :  { %v139_v36 = vpop.permute.xlu1 %138 }
 0x127   :  { %vm141_vm6 = vcmp.ge.f32.partialorder %v379_v0, %v139_v36  ;;  %vm142_vm7 = vcmp.ge.f32.partialorder %v381_v1, %v139_v36 }
 0x12f   :  { %v151_v38 = vpop.permute.xlu1 %150 }
 0x130   :  { %vm153_vm8 = vcmp.ge.f32.partialorder %v379_v0, %v151_v38  ;;  %vm154_vm9 = vcmp.ge.f32.partialorder %v381_v1, %v151_v38 }
 0x163   :  { %v81_v29 = vpop.permute.xlu2 %80 }
 0x164   :  { %v83_v30 = vadd.f32 %v81_v29, %v68_v11 }
 0x166   :  { %120 = vperm.xlu2 %226, %v83_v30   ;;  %103 = vperm.xlu1 %225, %v83_v30  }
 0x16b   :  { %v92_v31 = vpop.permute.xlu2 %91 }
 0x16c   :  { %v94_v32 = vadd.f32 %v92_v31, %v68_v11 }
 0x16e   :  { %227 = vset.pattern.permute.xlu2 %v344_v19  ;;  %231 = vset.pattern.permute.xlu1 %v343_v18 }
 0x16f   :  { %132 = vperm.xlu2 %227, %v83_v30   ;;  %168 = vperm.xlu1 %231, %v83_v30  }
 0x177   :  { %228 = vset.pattern.permute.xlu2 %v345_v20  ;;  %233 = vset.pattern.permute.xlu1 %v348_v27 }
 0x178   :  { %144 = vperm.xlu2 %228, %v83_v30   ;;  %181 = vperm.xlu1 %233, %v94_v32  }
 0x180   :  { %229 = vset.pattern.permute.xlu2 %v346_v21 }
 0x181   :  { %156 = vperm.xlu2 %229, %v83_v30  }
 0x189   :  { %232 = vset.pattern.permute.xlu2 %v348_v27 }
 0x18a   :  { %174 = vperm.xlu2 %232, %v68_v11  }
 0x1c0   :  { %v121_v35 = vpop.permute.xlu2 %120 }
 0x1c9   :  { %v133_v37 = vpop.permute.xlu2 %132 }
 0x1d2   :  { %v145_v39 = vpop.permute.xlu2 %144 }
 0x1d8   :  { %v104_v40 = vpop.permute.xlu1 %103 }
 0x1d9   :  { %v111_v42 = vsel %vm99_vm0, %v104_v40, %v109_v28  ;;  %v112_v43 = vsel %vm100_vm1, %v104_v40, %v109_v28 }
 0x1da   :  { %v123_v45 = vsel %vm117_vm2, %v121_v35, %v111_v42  ;;  %v124_v46 = vsel %vm118_vm3, %v121_v35, %v112_v43 }
 0x1db   :  { %v157_v44 = vpop.permute.xlu2 %156  ;;  %v135_v48 = vsel %vm129_vm4, %v133_v37, %v123_v45  ;;  %v136_v49 = vsel %vm130_vm5, %v133_v37, %v124_v46 }
 0x1dc   :  { %v147_v51 = vsel %vm141_vm6, %v145_v39, %v135_v48  ;;  %v148_v52 = vsel %vm142_vm7, %v145_v39, %v136_v49 }
 0x1dd   :  { %v159_v54 = vsel %vm153_vm8, %v157_v44, %v147_v51  ;;  %v160_v55 = vsel %vm154_vm9, %v157_v44, %v148_v52 }
 0x1e1   :  { %v169_v47 = vpop.permute.xlu1 %168 }
 0x1e2   :  { %v171_v56 = vsel %vm165_vm10, %v169_v47, %v159_v54  ;;  %v172_v57 = vsel %vm166_vm11, %v169_v47, %v160_v55 }
 0x1e4   :  { %v175_v53 = vpop.permute.xlu2 %174 }
 0x1e5   :  { %vm177_vm12 = vcmp.ge.f32.partialorder %v379_v0, %v175_v53  ;;  %vm178_vm13 = vcmp.ge.f32.partialorder %v381_v1, %v175_v53 }
 0x1ea   :  { %v182_v58 = vpop.permute.xlu1 %181 }
 0x1eb   :  { %v184_v59 = vsel %vm177_vm12, %v182_v58, %v171_v56  ;;  %v185_v60 = vsel %vm178_vm13, %v182_v58, %v172_v57 }
 0x1ec   :  { %186 = vst [vmem:[#allocation8] sm:$0xff] %v184_v59 }
 0x1ed   :  { %187 = vst [vmem:[#allocation8 + $0x8] sm:$0xff] %v185_v60 }
 0x1ee   :  { %198 = dma.vmem_to_hbm [thread:$0]  %s194_s27, 256, %s196_s30, [#allocation4]  }
 0x1ef   :  { %335 = dma.done.wait [#allocation4], 256  }
 0x1f0   :  { %336 = vsyncadd [#allocation4], 4294967040 }
 0x1f1   :  { %203 = vsyncpa [#allocation3], 1 }
 0x1f2   :  { %204 = vsyncpa [#allocation6], 1 }
 0x1f3   :  { %205 = vsyncpa [#allocation4], 1 }

</bundles_post_ra>
